<compile_context>
chip_gen: v7x
topology: tpu7x:2x2x1
jax: 0.10.0
libtpu: 0.0.40
codegen_flags: <defaults>
</compile_context>

<pallas_src>
import numpy as np
import jax
import jax.numpy as jnp
from jax.experimental import pallas as pl
from jax.experimental.pallas import tpu as pltpu


# ---- TrajParamIndex (consistent with the indices used by the reference) ----
class TrajParamIndex:
    X, Y, Z = 0, 1, 2
    VX, VY = 3, 4
    AX, AY = 5, 6
    LENGTH, WIDTH, HEIGHT = 7, 8, 9
    YAW = 10
    HAS_OBJECT = 11
    OBJECT_TYPE = 12
    END_OF_INDEX = 13


_LANE = 128  # lane-dense width for the tiny "exist" output (unmasked vst)


# -----------------------------------------------------------------------------
# Fused kernel: pairwise matching cost + existence BCE, one grid step per
# (decoder layer, batch) pair.
# -----------------------------------------------------------------------------
def _fused_cost_exist_kernel(pred_ref, gt_ref, gt_pos_t_ref, cost_ref, exist_ref):
    # pred_ref     : [1, 1, N, D]  predicted trajectory slab (full params)
    # gt_ref       : [1, M, D]     ground-truth trajectory slab (full params)
    # gt_pos_t_ref : [1, 3, M]     gt positions, lane-dense in M (prepared in jit)
    # cost_ref     : [1, 1, N, M]
    # exist_ref    : [1, 1, 1, _LANE]
    T = TrajParamIndex
    pred = pred_ref[0, 0]           # [N, D]
    gt = gt_ref[0]                  # [M, D]
    gpt = gt_pos_t_ref[0]           # [3, M]

    N = cost_ref.shape[2]
    M = cost_ref.shape[3]

    # Pairwise position distance; IoU terms of the reference are identically 0.
    acc = jnp.zeros((N, M), jnp.float32)
    for c in range(3):                            # unrolled over X, Y, Z
        p = pred[:, T.X + c:T.X + c + 1]          # [N, 1]
        g = gpt[c:c + 1, :]                       # [1, M] (M on lane axis)
        d = p - g
        acc = acc + d * d
    cost_ref[0, 0] = 0.1 * jnp.sqrt(acc)

    # Existence loss: BCE-with-logits over HAS_OBJECT, mean over queries.
    # (numerically stable form, same as PyTorch)
    x = pred[:, T.HAS_OBJECT:T.HAS_OBJECT + 1]    # [N, 1] logits
    y = gt[:, T.HAS_OBJECT:T.HAS_OBJECT + 1]      # [N, 1] targets (N == M)
    bce = jnp.maximum(x, 0.0) - x * y + jnp.log(1.0 + jnp.exp(-jnp.abs(x)))
    exist_ref[...] = jnp.full(exist_ref.shape, jnp.mean(bce), jnp.float32)


@jax.jit
def _device_forward(pred_all, gt):
    """pred_all: [L, B, N, D], gt: [B, M, D] -> (cost [L,B,N,M], exist [L,B])."""
    T = TrajParamIndex
    L, B, N, D = pred_all.shape
    M = gt.shape[1]
    pred_all = pred_all.astype(jnp.float32)
    gt = gt.astype(jnp.float32)
    # Lane-dense gt positions [B, 3, M]; fused by XLA inside this jit (no host op).
    gt_pos_t = jnp.swapaxes(gt[:, :, T.X:T.Z + 1], 1, 2)

    cost, exist = pl.pallas_call(
        _fused_cost_exist_kernel,
        out_shape=(jax.ShapeDtypeStruct((L, B, N, M), jnp.float32),
                   jax.ShapeDtypeStruct((L, B, 1, _LANE), jnp.float32)),
        grid=(L, B),
        in_specs=[pl.BlockSpec((1, 1, N, D), lambda l, b: (l, b, 0, 0)),
                  pl.BlockSpec((1, M, D), lambda l, b: (b, 0, 0)),
                  pl.BlockSpec((1, 3, M), lambda l, b: (b, 0, 0))],
        out_specs=(pl.BlockSpec((1, 1, N, M), lambda l, b: (l, b, 0, 0)),
                   pl.BlockSpec((1, 1, 1, _LANE), lambda l, b: (l, b, 0, 0))),
        compiler_params=pltpu.CompilerParams(
            dimension_semantics=("parallel", "parallel")),
    )(pred_all, gt, gt_pos_t)
    return cost, exist[:, :, 0, 0]


# -----------------------------------------------------------------------------
# Host-side matching (data-dependent, sequential -> not a Pallas kernel)
# -----------------------------------------------------------------------------
def _hungarian_or_greedy(cost_np):
    # TODO(synk): Hungarian assignment is inherently sequential / host-side.
    N, M = cost_np.shape
    if N == 0 or M == 0:
        return []
    try:
        from scipy.optimize import linear_sum_assignment
        row_ind, col_ind = linear_sum_assignment(cost_np)
        return list(zip(row_ind.tolist(), col_ind.tolist()))
    except ImportError:
        matches = []
        cm = cost_np.astype(np.float64).copy()
        while len(matches) < min(N, M):
            flat = int(np.argmin(cm))
            i, j = flat // M, flat % M
            if cm[i, j] < np.inf:
                matches.append((i, j))
                cm[i, :] = np.inf
                cm[:, j] = np.inf
            else:
                break
        return matches


# -----------------------------------------------------------------------------
# Per-layer loss assembly on host (mirrors TrajectoryLoss._compute_losses).
# Matched-pair L1 is done directly in numpy on the already-transferred arrays
# (per perf review: strictly faster than a per-batch H2D + kernel round-trip).
# -----------------------------------------------------------------------------
def _compute_losses_host(pred_np, gt_np, cost_np, exist_np, prefix=""):
    # pred_np [B,N,D], gt_np [B,M,D], cost_np [B,N,M], exist_np [B]
    T = TrajParamIndex
    B = pred_np.shape[0]
    losses = {}
    for b in range(B):
        vp = np.where(pred_np[b, :, T.HAS_OBJECT] > 0.5)[0]
        vt = np.where(gt_np[b, :, T.HAS_OBJECT] > 0.5)[0]

        matches = []
        if len(vp) > 0 and len(vt) > 0:
            cost = cost_np[b][np.ix_(vp, vt)]
            matches = _hungarian_or_greedy(cost)

        if matches:
            pi = vp[np.array([i for i, _ in matches], dtype=np.int64)]
            gi = vt[np.array([j for _, j in matches], dtype=np.int64)]
            ad = np.abs(pred_np[b, pi].astype(np.float32)
                        - gt_np[b, gi].astype(np.float32))          # [K, D]
            losses[prefix + "loss_pos"] = float(ad[:, [T.X, T.Y, T.Z]].mean())
            losses[prefix + "loss_vel"] = float(ad[:, [T.VX, T.VY]].mean())
            losses[prefix + "loss_acc"] = float(ad[:, [T.AX, T.AY]].mean())
            losses[prefix + "loss_dim"] = float(
                ad[:, [T.LENGTH, T.WIDTH, T.HEIGHT]].mean())
            losses[prefix + "loss_yaw"] = float(ad[:, T.YAW].mean())
            # F.cross_entropy over a single-class logit column is identically 0
            # for valid (==0) targets, which is what the reference computes.
            losses[prefix + "loss_type"] = 0.0

        # Same dict-overwrite-per-batch semantics as the reference.
        losses[prefix + "loss_exist"] = float(exist_np[b])
    return losses


class TrajectoryLoss:
    """JAX/Pallas port of the PyTorch TrajectoryLoss module."""

    def __init__(self, weight_dict=None, frames=10, dt=0.1,
                 iou_method="iou2", aux_loss_weight=0.5):
        self.weight_dict = weight_dict or {"loss_traj": 1.0, "loss_type": 0.1,
                                           "loss_exist": 1.0}
        self.frames = frames
        self.dt = dt
        self.iou_method = iou_method
        self.aux_loss_weight = aux_loss_weight

    def __call__(self, outputs, targets):
        num_layers = len(outputs)
        # Stack all decoder layers -> one fused, jitted pallas_call.
        pred_all = jnp.stack([o["traj_params"] for o in outputs], axis=0)  # [L,B,N,D]
        for o in outputs:
            _ = o["type_logits"]  # read but unused, as in the reference
        gt = jnp.asarray(targets["trajs"])                                  # [B,M,D]

        cost_all, exist_all = _device_forward(pred_all, gt)

        # Single blocking device->host sync for everything the host loop needs.
        cost_np, exist_np, pred_np, gt_np = jax.device_get(
            (cost_all, exist_all, pred_all, gt))

        losses = {}
        for idx in range(num_layers):
            prefix = f"layer_{idx}_" if idx < num_layers - 1 else ""
            layer_losses = _compute_losses_host(
                pred_np[idx], gt_np, cost_np[idx], exist_np[idx], prefix)
            if idx < num_layers - 1:
                layer_losses = {k: self.aux_loss_weight * v
                                for k, v in layer_losses.items()}
            losses.update(layer_losses)

        return {k: jnp.asarray(self.weight_dict[k] * v, dtype=jnp.float32)
                for k, v in losses.items() if k in self.weight_dict}


if __name__ == "__main__":
    key = jax.random.PRNGKey(0)
    B, N = 2, 8
    D = TrajParamIndex.END_OF_INDEX   # 13
    num_layers, num_types = 2, 4
    T = TrajParamIndex
    keys = jax.random.split(key, 3 * num_layers + 2)

    def make_pred(k1, k2):
        base = jax.random.normal(k1, (B, N, D), dtype=jnp.float32)
        has_logit = jax.random.uniform(k2, (B, N), dtype=jnp.float32) * 2.0 - 0.5
        base = base.at[:, :, T.HAS_OBJECT].set(has_logit)
        base = base.at[:, :, T.OBJECT_TYPE].set(0.0)
        return base

    def make_gt(k1, k2):
        base = jax.random.normal(k1, (B, N, D), dtype=jnp.float32)
        has = (jax.random.uniform(k2, (B, N)) > 0.4).astype(jnp.float32)   # {0,1}
        base = base.at[:, :, T.HAS_OBJECT].set(has)
        # keep GT object type == 0 so the (degenerate) single-class cross entropy
        # in the reference is well defined
        base = base.at[:, :, T.OBJECT_TYPE].set(0.0)
        return base

    outputs = []
    for l in range(num_layers):
        traj = make_pred(keys[3 * l], keys[3 * l + 1])
        logits = jax.random.normal(keys[3 * l + 2], (B, N, num_types),
                                   dtype=jnp.float32)
        outputs.append({"traj_params": traj, "type_logits": logits})
    targets = {"trajs": make_gt(keys[-2], keys[-1])}

    loss_fn = TrajectoryLoss()
    result = loss_fn(outputs, targets)
    for v in result.values():
        jax.block_until_ready(v)
    print("KERNEL_OK")
</pallas_src>

<mosaic_0001>
module attributes {stable_mosaic.version = 11 : i64} {
  func.func @_fused_cost_exist_kernel(%arg0: i32, %arg1: i32, %arg2: memref<1x1x8x13xf32, #tpu.memory_space<vmem>>, %arg3: memref<1x8x13xf32, #tpu.memory_space<vmem>>, %arg4: memref<1x3x8xf32, #tpu.memory_space<vmem>>, %arg5: memref<1x1x8x8xf32, #tpu.memory_space<vmem>>, %arg6: memref<1x1x1x128xf32, #tpu.memory_space<vmem>>) attributes {dimension_semantics = [#tpu.dimension_semantics<parallel>, #tpu.dimension_semantics<parallel>], iteration_bounds = array<i64: 2, 2>, scalar_prefetch = 0 : i64, scratch_operands = 0 : i64, tpu.core_type = #tpu.core_type<tc>, window_params = [{transform_indices = @transform_0, window_bounds = array<i64: 1, 1, 8, 13>}, {transform_indices = @transform_1, window_bounds = array<i64: 1, 8, 13>}, {transform_indices = @transform_2, window_bounds = array<i64: 1, 3, 8>}, {transform_indices = @transform_3, window_bounds = array<i64: 1, 1, 8, 8>}, {transform_indices = @transform_4, window_bounds = array<i64: 1, 1, 1, 128>}]} {
    %c0 = arith.constant 0 : index
    %c0_0 = arith.constant 0 : index
    %c0_1 = arith.constant 0 : index
    %c0_2 = arith.constant 0 : index
    %0 = vector.load %arg2[%c0, %c0_0, %c0_1, %c0_2] : memref<1x1x8x13xf32, #tpu.memory_space<vmem>>, vector<1x1x8x13xf32>
    %1 = vector.shape_cast %0 : vector<1x1x8x13xf32> to vector<8x13xf32>
    %c0_3 = arith.constant 0 : index
    %c0_4 = arith.constant 0 : index
    %c0_5 = arith.constant 0 : index
    %2 = vector.load %arg3[%c0_3, %c0_4, %c0_5] : memref<1x8x13xf32, #tpu.memory_space<vmem>>, vector<1x8x13xf32>
    %3 = vector.shape_cast %2 : vector<1x8x13xf32> to vector<8x13xf32>
    %c0_6 = arith.constant 0 : index
    %c0_7 = arith.constant 0 : index
    %c0_8 = arith.constant 0 : index
    %4 = vector.load %arg4[%c0_6, %c0_7, %c0_8] : memref<1x3x8xf32, #tpu.memory_space<vmem>>, vector<1x3x8xf32>
    %5 = vector.shape_cast %4 : vector<1x3x8xf32> to vector<3x8xf32>
    %cst = arith.constant 0.000000e+00 : f32
    %6 = vector.broadcast %cst : f32 to vector<8x8xf32>
    %7 = vector.extract_strided_slice %1 {offsets = [0, 0], sizes = [8, 1], strides = [1, 1]} : vector<8x13xf32> to vector<8x1xf32>
    %8 = vector.extract_strided_slice %5 {offsets = [0, 0], sizes = [1, 8], strides = [1, 1]} : vector<3x8xf32> to vector<1x8xf32>
    %9 = vector.broadcast %7 : vector<8x1xf32> to vector<8x8xf32>
    %10 = vector.broadcast %8 : vector<1x8xf32> to vector<8x8xf32>
    %11 = arith.subf %9, %10 : vector<8x8xf32>
    %12 = arith.mulf %11, %11 : vector<8x8xf32>
    %13 = arith.addf %6, %12 : vector<8x8xf32>
    %14 = vector.extract_strided_slice %1 {offsets = [0, 1], sizes = [8, 1], strides = [1, 1]} : vector<8x13xf32> to vector<8x1xf32>
    %15 = vector.extract_strided_slice %5 {offsets = [1, 0], sizes = [1, 8], strides = [1, 1]} : vector<3x8xf32> to vector<1x8xf32>
    %16 = vector.broadcast %14 : vector<8x1xf32> to vector<8x8xf32>
    %17 = vector.broadcast %15 : vector<1x8xf32> to vector<8x8xf32>
    %18 = arith.subf %16, %17 : vector<8x8xf32>
    %19 = arith.mulf %18, %18 : vector<8x8xf32>
    %20 = arith.addf %13, %19 : vector<8x8xf32>
    %21 = vector.extract_strided_slice %1 {offsets = [0, 2], sizes = [8, 1], strides = [1, 1]} : vector<8x13xf32> to vector<8x1xf32>
    %22 = vector.extract_strided_slice %5 {offsets = [2, 0], sizes = [1, 8], strides = [1, 1]} : vector<3x8xf32> to vector<1x8xf32>
    %23 = vector.broadcast %21 : vector<8x1xf32> to vector<8x8xf32>
    %24 = vector.broadcast %22 : vector<1x8xf32> to vector<8x8xf32>
    %25 = arith.subf %23, %24 : vector<8x8xf32>
    %26 = arith.mulf %25, %25 : vector<8x8xf32>
    %27 = arith.addf %20, %26 : vector<8x8xf32>
    %28 = math.sqrt %27 : vector<8x8xf32>
    %cst_9 = arith.constant 1.000000e-01 : f32
    %29 = vector.broadcast %cst_9 : f32 to vector<8x8xf32>
    %30 = arith.mulf %29, %28 : vector<8x8xf32>
    %c0_10 = arith.constant 0 : index
    %c0_11 = arith.constant 0 : index
    %c0_12 = arith.constant 0 : index
    %c0_13 = arith.constant 0 : index
    %31 = vector.load %arg5[%c0_10, %c0_11, %c0_12, %c0_13] : memref<1x1x8x8xf32, #tpu.memory_space<vmem>>, vector<1x1x8x8xf32>
    %32 = vector.shape_cast %31 : vector<1x1x8x8xf32> to vector<8x8xf32>
    %33 = vector.shape_cast %30 : vector<8x8xf32> to vector<1x1x8x8xf32>
    tpu.vector_store %arg5[%c0_10, %c0_11, %c0_12, %c0_13], %33 {strides = array<i32>} : memref<1x1x8x8xf32, #tpu.memory_space<vmem>>, vector<1x1x8x8xf32>,
    %34 = vector.extract_strided_slice %1 {offsets = [0, 11], sizes = [8, 1], strides = [1, 1]} : vector<8x13xf32> to vector<8x1xf32>
    %35 = vector.extract_strided_slice %3 {offsets = [0, 11], sizes = [8, 1], strides = [1, 1]} : vector<8x13xf32> to vector<8x1xf32>
    %cst_14 = arith.constant 0.000000e+00 : f32
    %36 = vector.broadcast %cst_14 : f32 to vector<8x1xf32>
    %37 = arith.maximumf %34, %36 : vector<8x1xf32>
    %38 = arith.mulf %34, %35 : vector<8x1xf32>
    %39 = arith.subf %37, %38 : vector<8x1xf32>
    %40 = math.absf %34 : vector<8x1xf32>
    %cst_15 = arith.constant 0.000000e+00 : f32
    %41 = vector.broadcast %cst_15 : f32 to vector<8x1xf32>
    %42 = arith.subf %41, %40 : vector<8x1xf32>
    %43 = math.exp %42 : vector<8x1xf32>
    %cst_16 = arith.constant 1.000000e+00 : f32
    %44 = vector.broadcast %cst_16 : f32 to vector<8x1xf32>
    %45 = arith.addf %44, %43 : vector<8x1xf32>
    %46 = math.log %45 : vector<8x1xf32>
    %47 = arith.addf %39, %46 : vector<8x1xf32>
    %48 = vector.shape_cast %47 : vector<8x1xf32> to vector<1x8x1xf32>
    %cst_17 = arith.constant dense<0.000000e+00> : vector<1xf32>
    %49 = vector.multi_reduction <add>, %48, %cst_17 [1, 2] : vector<1x8x1xf32> to vector<1xf32>
    %50 = vector.shape_cast %49 : vector<1xf32> to vector<1x1x1xf32>
    %51 = vector.extract %50[0, 0, 0] : f32 from vector<1x1x1xf32>
    %cst_18 = arith.constant 8.000000e+00 : f32
    %52 = arith.divf %51, %cst_18 : f32
    %53 = vector.broadcast %52 : f32 to vector<1x1x1x128xf32>
    %c0_19 = arith.constant 0 : index
    %c0_20 = arith.constant 0 : index
    %c0_21 = arith.constant 0 : index
    %c0_22 = arith.constant 0 : index
    %54 = vector.load %arg6[%c0_19, %c0_20, %c0_21, %c0_22] : memref<1x1x1x128xf32, #tpu.memory_space<vmem>>, vector<1x1x1x128xf32>
    tpu.vector_store %arg6[%c0_19, %c0_20, %c0_21, %c0_22], %53 {strides = array<i32>} : memref<1x1x1x128xf32, #tpu.memory_space<vmem>>, vector<1x1x1x128xf32>,
    return
  }
  func.func @transform_0(%arg0: i32, %arg1: i32) -> (i32, i32, i32, i32) {
    %c0_i32 = arith.constant 0 : i32
    %c0_i32_0 = arith.constant 0 : i32
    %c0_i32_1 = arith.constant 0 : i32
    return %arg0, %arg1, %c0_i32, %c0_i32_0 : i32, i32, i32, i32
  }
  func.func @transform_1(%arg0: i32, %arg1: i32) -> (i32, i32, i32) {
    %c0_i32 = arith.constant 0 : i32
    %c0_i32_0 = arith.constant 0 : i32
    %c0_i32_1 = arith.constant 0 : i32
    return %arg1, %c0_i32, %c0_i32_0 : i32, i32, i32
  }
  func.func @transform_2(%arg0: i32, %arg1: i32) -> (i32, i32, i32) {
    %c0_i32 = arith.constant 0 : i32
    %c0_i32_0 = arith.constant 0 : i32
    %c0_i32_1 = arith.constant 0 : i32
    return %arg1, %c0_i32, %c0_i32_0 : i32, i32, i32
  }
  func.func @transform_3(%arg0: i32, %arg1: i32) -> (i32, i32, i32, i32) {
    %c0_i32 = arith.constant 0 : i32
    %c0_i32_0 = arith.constant 0 : i32
    %c0_i32_1 = arith.constant 0 : i32
    return %arg0, %arg1, %c0_i32, %c0_i32_0 : i32, i32, i32, i32
  }
  func.func @transform_4(%arg0: i32, %arg1: i32) -> (i32, i32, i32, i32) {
    %c0_i32 = arith.constant 0 : i32
    %c0_i32_0 = arith.constant 0 : i32
    %c0_i32_1 = arith.constant 0 : i32
    return %arg0, %arg1, %c0_i32, %c0_i32_0 : i32, i32, i32, i32
  }
}

</mosaic_0001>

<bundles_post_ra>
// kernel: _device_forward.1
= control target key start
LH: loop header
LB: loop body
LE: loop exit
PB: predicated region body
PF: predicated region fallthrough
CT: control target
= control target key end

     0   :  { %s1011_s0 = inlined_call_operand.hbm [shape: f32[2,2,8,13], index: 0, kind: input, shape index: {}]   ;;  %s1012_s1 = inlined_call_operand.vmem [shape: f32[2,8,13], index: 1, kind: input, shape index: {}]   ;;  %s1013_s2 = inlined_call_operand.vmem [shape: f32[2,3,8], index: 2, kind: input, shape index: {}]   ;;  %s1014_s3 = inlined_call_operand.hbm [shape: f32[2,2,8,8], index: 3, kind: output, shape index: {0}]   ;;  %s1015_s4 = inlined_call_operand.vmem [shape: f32[2,2,1,128], index: 4, kind: output, shape index: {1}]  }
   0x1   :  { %1018 = sst [smem:[#allocation9_spill]] %s1011_s0 }
   0x2   :  { %10 = vsyncpa [#allocation3], 0 }
   0x3   :  { %12 = vsyncpa [#allocation3 + $0x1], 0 }
   0x4   :  { %13 = vsyncpa [#allocation4], 0 }
   0x5   :  { %15 = vsyncpa [#allocation4 + $0x1], 0  ;;  %s801_s15 = smov 0   ;;  %s803_s16 = smov 0  }
   0x6   :  { %s805_s17 = smov 0   ;;  %s807_s18 = smov 0  }
   0x7   :  { %s809_s19 = smov 0   ;;  %s811_s20 = smov 0  }
   0x8   :  { %s813_s21 = smov 0   ;;  %s815_s22 = smov 0  }
   0x9 LB: > { %s528_s23 = sadd.s32 4294967295, %s768_s22   ;;  %s529_s24 = sadd.s32 4294967294, %s768_s22   ;;  %s768_s22 = sphi %s815_s22, %s21_s22   ;;  %s764_s21 = sphi %s813_s21, %s1037_s21   ;;  %s760_s20 = sphi %s811_s20, %s1036_s20   ;;  %s756_s19 = sphi %s809_s19, %s1035_s19   ;;  %s752_s18 = sphi %s807_s18, %s1034_s18   ;;  %s748_s17 = sphi %s805_s17, %s1033_s17   ;;  %s744_s16 = sphi %s803_s16, %s1032_s16   ;;  %s740_s15 = sphi %s801_s15, %s1031_s15  }
   0xa   : > { %s30_s25 = sadd.s32 1, %s760_s20  ;;  %s33_s26 = sadd.s32 1, %s764_s21 }
   0xb   : > { %p31_p0 = scmp.ge.s32.totalorder %s30_s25, 2  ;;  %s42_s27 = sadd.s32 1, %s748_s17 }
   0xc   : > { %p49_p1 = scmp.ne.s32.totalorder %s748_s17, %s744_s16  ;;  %p50_p2 = scmp.eq.s32.totalorder %s768_s22, 0 }
   0xd   : > { %s1039_s25 = smov (%p31_p0, %s30_s25), 0  ;;  %s1041_s26 = smov (!%p31_p0, %s33_s26), %s764_s21 }
   0xe   : > { %s38_s28 = ssub.s32 %s760_s20, %s1039_s25  ;;  %p854_p3 = por %p50_p2, %p49_p1 }
   0xf   : > { %p35_p4 = scmp.ge.s32.totalorder %s1041_s26, 2  ;;  %p55_p5 = scmp.ne.s32.totalorder %s744_s16, %s740_s15 }
  0x10   : > { %p56_p6 = scmp.eq.s32.totalorder %s528_s23, 0  ;;  %p133_p7 = scmp.eq.s32.totalorder %s528_s23, 3 }
  0x11   : > { %s1043_s26 = smov (%p35_p4, %s1041_s26), 0  ;;  %p139_p10 = scmp.eq.s32.totalorder %s529_s24, 3 }
  0x12   : > { %1020 = sst [smem:[#allocation8_spill]] %s1043_s26  ;;  %p862_p8 = por %p56_p6, %p55_p5 }
  0x13   : > { %p866_p9 = por %p133_p7, %p49_p1  ;;  %s37_s6 = ssub.s32 %s764_s21, %s1043_s26 }
  0x14   : > { %s39_s7 = sor.u32 %s38_s28, %s37_s6  ;;  %p872_p12 = por %p139_p10, %p55_p5 }
  0x15   : > { %s1022_s5 = scalar_select %p866_p9, 1, 0 }
  0x16   : > { %p40_p11 = scmp.eq.s32.totalorder %s39_s7, 0  ;;  %p560_p13 = scmp.lt.s32.totalorder %s768_s22, 4 }
  0x17   : > { %s1023_s8 = scalar_select %p872_p12, 1, 0 }
  0x18   : > { %s187_s9 = sand.u32 1, %s748_s17   ;;  %s533_s12 = sshll.u32 %s764_s21, 1 }
  0x19   : > { %s879_s10 = scalar_select %p40_p11, %s748_s17, %s42_s27  }
  0x1a   : > { %s532_s11 = sshll.u32 %s187_s9, 3  ;;  %s196_s13 = sadd.s32 %s760_s20, %s533_s12 }
  0x1b   : > { %s191_s14 = scalar_lea.vmem [#allocation2], %s532_s11  ;;  %s534_s26 = sshll.u32 %s196_s13, 7 }
  0x1c   : > { %s200_s23 = sshll.u32 %s191_s14, 4  ;;  %s1024_s0 = sld [smem:[#allocation9_spill]]  ;;  %s883_s23 = int_to_ptr.vmem [resolvable:$true] %s200_s23 }
  0x1d   : > { %p892_p0 = pnand %p560_p13, %p854_p3  ;;  %s188_s7 = scalar_lea.sflag [#allocation3], %s187_s9 }
  0x1f   : > { %p642_p5 = pneg %p892_p0 }
  0x22   : > { %s888_s6 = scalar_lea.hbm %s1024_s0, %s534_s26  ;;  %s645_s12 = scalar_lea.hbm %s1024_s0, 512 }
  0x23   : > { %s640_s11 = scalar_lea.hbm %s888_s6, 128  ;;  %p646_p3 = scmp.lt.u32.totalorder %s888_s6, %s1024_s0 }
  0x24   : > { %p641_p4 = scmp.ne.s32.totalorder %s888_s6, %s640_s11  ;;  %p647_p10 = scmp.lt.u32.totalorder %s645_s12, %s640_s11 }
  0x25   : > { %p649_p13 = scmp.lt.u32.totalorder %s640_s11, %s888_s6 }
  0x26   : > { %p643_p6 = pnand %p642_p5, %p641_p4  ;;  %p648_p11 = por %p647_p10, %p646_p3 }
  0x28   : > { %p644_p7 = pneg %p643_p6  ;;  %p650_p1 = por %p649_p13, %p648_p11 }
  0x2a   : > { %p651_p2 = pnand %p650_p1, %p644_p7 }
  0x2c   : > { %654 = shalt.err (!%p651_p2)
}
  0x2d   : > { %s655_s9 = scalar_lea.vmem %s883_s23, 128  ;;  %s770_s24 = smov [#allocation2]  }
  0x2e   : > { %p656_p4 = scmp.ne.s32.totalorder %s883_s23, %s655_s9  ;;  %s660_s28 = sshll.u32 %s770_s24, 4  ;;  %s661_s28 = int_to_ptr.vmem [resolvable:$false] %s660_s28 }
  0x2f   : > { %s662_s26 = scalar_lea.vmem %s661_s28, 256  ;;  %p663_p9 = scmp.lt.s32.totalorder %s883_s23, %s661_s28 }
  0x30   : > { %p658_p6 = pnand %p656_p4, %p642_p5  ;;  %p664_p3 = scmp.lt.s32.totalorder %s662_s26, %s655_s9 }
  0x32   : > { %p659_p12 = pneg %p658_p6  ;;  %p665_p10 = por %p664_p3, %p663_p9 }
  0x34   : > { %p666_p11 = pnand %p665_p10, %p659_p12 }
  0x36   : > { %669 = shalt.err (!%p666_p11)
}
  0x37   : > { %555 = dma.hbm_to_vmem [thread:$0]  (!%p892_p0), %s888_s6, 128, %s883_s23, %s188_s7  }
  0x38   : > { %p1026_p1 = scmp.lt.s32.totalorder %s768_s22, 5  ;;  %p1027_p2 = scmp.ge.s32.totalorder %s768_s22, 1 }
  0x3a   : > { %p220_p5 = pnand %p1027_p2, %p1026_p1 }
  0x3b   : > { %s928_s11 = sand.u32 (!%p220_p5), 1, %s744_s16  }
  0x3c   : > { %223 = sbr.rel (%p220_p5) target bundleno = 427 (0x1ab), region = 32  ;;  %s536_s29 = sshll.u32 (!%p220_p5), %s928_s11, 3 }
  0x3d   : > { %s226_s12 = scalar_lea.sflag (!%p220_p5), [#allocation3], %s928_s11  ;;  %s229_s27 = scalar_lea.vmem (!%p220_p5), [#allocation2], %s536_s29 }
  0x43   : > { %731 = dma.done.wait (%p862_p8), %s226_s12, 128  }
  0x44   : > { %733 = vsyncadd (%p862_p8), %s226_s12, 4294967168  ;;  %v284_v0 = vld [vmem:[%s229_s27] sm:$0xff]  ;;  %p269_p9 = scmp.lt.s32.totalorder %s752_s18, 1  ;;  %v771_v7 = vmov 0   ;;  %v772_v8 = vmov 2   ;;  %v773_v12 = vmov 1   ;;  %v292_v18 = vlaneseq }
  0x45   : > { %v334_v1 = vand.u32 2147483647, %v284_v0  ;;  %630 = vset.pattern.permute.xlu1 %v771_v7  ;;  %633 = vset.pattern.permute.xlu0 %v772_v8  ;;  %v331_v9 = vmax.f32 %v284_v0, 0.0  ;;  %s774_s30 = smov 117   ;;  %vm346_vm0 = vcmask 7168   ;;  %vm329_vm3 = vcmask 64512  }
  0x46   : > { %s940_s23 = scalar_select %p269_p9, %s752_s18, 1  ;;  %289 = vperm.xlu1 %630, %v284_v0   ;;  %v293_v19 = vshrl.u32 %v292_v18, 7 }
  0x47   : > { %v335_v2 = vsub.f32 0.0, %v334_v1  ;;  %s259_s12 = scalar_lea.vmem [#allocation5], %s536_s29  ;;  %s542_s27 = sshll.u32 %s756_s19, 1 }
  0x48   : > { %s538_s6 = sshll.u32 %s940_s23, 3  ;;  %s539_s9 = sshll.u32 %s940_s23, 2  ;;  %v294_v22 = vsub.s32 0, %v293_v19  ;;  %v305_v25 = vsub.s32 1, %v293_v19  ;;  %v316_v27 = vsub.s32 2, %v293_v19 }
  0x49   : > { %v336_v3 = vmul.f32 1.442695, %v335_v2  ;;  %s272_s14 = scalar_lea.vmem %s1012_s1, %s538_s6  ;;  %s276_s26 = scalar_lea.vmem %s1013_s2, %s539_s9 }
  0x4a   : > { %v285_v6 = vld [vmem:[%s272_s14] sm:$0xff]  ;;  %631 = vset.pattern.permute.xlu1 %v773_v12  ;;  %s381_s6 = sadd.s32 %s752_s18, %s542_s27  ;;  %s385_s13 = sshll.u32 %s259_s12, 4  ;;  %s386_s13 = int_to_ptr.vmem [resolvable:$true] %s385_s13 }
  0x4b   : > { %634 = vpow2.f32 %v336_v3  ;;  %v332_v10 = vmul.f32 %v285_v6, %v284_v0  ;;  %300 = vperm.xlu1 %631, %v284_v0   ;;  %v286_v21 = vld [vmem:[%s276_s26] sm:$0x7]  ;;  %s543_s7 = sshll.u32 %s381_s6, 7  ;;  %s363_s24 = scalar_lea.sflag [#allocation4], %s928_s11 }
  0x4c   : > { %v295_v23 = vrot.slane %v286_v21, %v294_v22  ;;  %v306_v28 = vrot.slane %v286_v21, %v305_v25  ;;  %v317_v29 = vrot.slane %v286_v21, %v316_v27  ;;  %s957_s9 = scalar_lea.hbm %s1014_s3, %s543_s7  ;;  %s670_s28 = scalar_lea.vmem %s386_s13, 128 }
  0x4d   : > { %v333_v11 = vsub.f32 %v331_v9, %v332_v10  ;;  %p671_p8 = scmp.ne.s32.totalorder %s386_s13, %s670_s28  ;;  %p1028_p12 = scmp.ne.s32.totalorder %s1022_s5, 0 }
  0x4e   : > { %s775_s26 = smov [#allocation5]  }
  0x4f   : > { %632 = vset.pattern.permute.xlu1 %v772_v8  ;;  %p672_p0 = pnand %p671_p8, %p1028_p12  ;;  %s674_s0 = sshll.u32 %s775_s26, 4  ;;  %s675_s0 = int_to_ptr.vmem [resolvable:$false] %s674_s0 }
  0x50   : > { %311 = vperm.xlu1 %632, %v284_v0   ;;  %s676_s29 = scalar_lea.vmem %s675_s0, 256  ;;  %p677_p13 = scmp.lt.s32.totalorder %s386_s13, %s675_s0 }
  0x51   : > { %p673_p7 = pneg %p672_p0  ;;  %p678_p4 = scmp.lt.s32.totalorder %s676_s29, %s670_s28 }
  0x53   : > { %p679_p6 = por %p678_p4, %p677_p13 }
  0x55   : > { %v635_v4 = vpop.eup %634  ;;  %p680_p3 = pnand %p679_p6, %p673_p7 }
  0x56   : > { %v338_v5 = vadd.f32 1.0, %v635_v4 }
  0x58   : > { %636 = vlog2.f32 %v338_v5 }
  0x62   : > { %v637_v13 = vpop.eup %636 }
  0x63   : > { %v340_v14 = vmul.f32 0.6931472, %v637_v13 }
  0x65   : > { %v341_v15 = vadd.f32 %v340_v14, %v333_v11 }
  0x67   : > { %343 = vrot.lane.b32.xlu0 %v341_v15, %s774_s30 }
  0xc5   : > { %v290_v20 = vpop.permute.xlu1 %289 }
  0xc6   : > { %v296_v24 = vsub.f32 %v290_v20, %v295_v23 }
  0xc8   : > { %v297_v30 = vmul.f32 %v296_v24, %v296_v24 }
  0xca   : > { %v301_v26 = vpop.permute.xlu1 %300 }
  0xcb   : > { %v307_v31 = vsub.f32 %v301_v26, %v306_v28 }
  0xcd   : > { %v308_v34 = vmul.f32 %v307_v31, %v307_v31 }
  0xcf   : > { %v312_v32 = vpop.permute.xlu1 %311  ;;  %v309_v36 = vadd.f32 %v308_v34, %v297_v30 }
  0xd0   : > { %v318_v33 = vsub.f32 %v312_v32, %v317_v29 }
  0xd2   : > { %v319_v35 = vmul.f32 %v318_v33, %v318_v33 }
  0xd4   : > { %v320_v37 = vadd.f32 %v319_v35, %v309_v36 }
  0xd6   : > { %638 = vrsqrt.f32 %v320_v37  ;;  %vm323_vm1 = vcmp.eq.f32.partialorder %v320_v37, inf  ;;  %v326_v40 = vand.u32 2147483648, %v320_v37  ;;  %vm325_vm2 = vcmp.eq.f32.partialorder %v320_v37, 0.0 }
  0xd9   : > { %v344_v16 = vpop.permute.xlu0 %343 }
  0xda   : > { %v347_v17 = vsel %vm346_vm0, %v344_v16, 0.0 }
  0xdb   : > { %348 = vadd.xlane.f32.xlu0 %v347_v17 }
  0xe0   : > { %v639_v38 = vpop.eup %638 }
  0xe1   : > { %v322_v39 = vmul.f32 %v639_v38, %v320_v37 }
  0xe3   : > { %v324_v41 = vsel %vm323_vm1, %v320_v37, %v322_v39 }
  0xe4   : > { %v327_v42 = vsel %vm325_vm2, %v326_v40, %v324_v41 }
  0xe5   : > { %v328_v43 = vmul.f32 0.1, %v327_v42 }
  0xe7   : > { %330 = vst.msk [vmem:[%s259_s12] sm:$0xff] %vm329_vm3, %v328_v43 }
  0xe8   : > { %683 = shalt.err (!%p680_p3)
}
  0xe9   : > { %s684_s18 = scalar_lea.hbm %s957_s9, 128  ;;  %s688_s27 = scalar_lea.hbm %s1014_s3, 512 }
  0xea   : > { %p685_p10 = scmp.ne.s32.totalorder %s957_s9, %s684_s18  ;;  %p689_p2 = scmp.lt.u32.totalorder %s957_s9, %s1014_s3 }
  0xeb   : > { %p690_p5 = scmp.lt.u32.totalorder %s688_s27, %s684_s18  ;;  %p692_p8 = scmp.lt.u32.totalorder %s684_s18, %s957_s9 }
  0xec   : > { %p686_p11 = pnand %p685_p10, %p1028_p12 }
  0xed   : > { %p691_p9 = por %p690_p5, %p689_p2 }
  0xee   : > { %p687_p1 = pneg %p686_p11 }
  0xef   : > { %p693_p0 = por %p692_p8, %p691_p9 }
  0xf1   : > { %p694_p7 = pnand %p693_p0, %p687_p1 }
  0xf3   : > { %697 = shalt.err (!%p694_p7)
}
  0xf4   : > { %550 = dma.vmem_to_hbm [thread:$0]  (%p1028_p12), %s386_s13, 128, %s957_s9, %s363_s24  }
  0xf5   : > { %p277_p13 = scmp.lt.s32.totalorder %s756_s19, 1 }
  0xf7   : > { %s1045_s19 = smov (!%p277_p13, %s756_s19), 1 }
  0xf8   : > { %s540_s7 = sshll.u32 %s1045_s19, 1 }
  0xf9   : > { %s282_s14 = sadd.s32 %s540_s7, %s940_s23 }
  0xfa   : > { %s283_s26 = scalar_lea.vmem %s1015_s4, %s282_s14 }
 0x168   : > { %v349_v44 = vpop.xlane.xlu0 %348 }
 0x169   : > { %v350_v45 = vrot.slane %v349_v44, 4 }
 0x16b   : > { %v351_v46 = vadd.f32 %v350_v45, %v349_v44 }
 0x16d   : > { %v352_v47 = vrot.slane %v351_v46, 2 }
 0x16f   : > { %v353_v48 = vadd.f32 %v352_v47, %v351_v46 }
 0x171   : > { %v354_v49 = vrot.slane %v353_v48, 1 }
 0x173   : > { %v355_v50 = vadd.f32 %v354_v49, %v353_v48 }
 0x175   : > { %546 = vpush %v355_v50 }
 0x1a6   : > { %s547_s30 = spop %546 }
 0x1a7   : > { %s359_s29 = smul.f32 0.125, %s547_s30 }
 0x1a9   : > { %v360_v51 = vstv %s359_s29 }
 0x1aa   : > { %361 = vst [vmem:[%s283_s26] sm:$0x1] %v360_v51 }
 0x1ab PF: > { %p561_p12 = scmp.ge.s32.totalorder %s768_s22, 2  ;;  %s400_s13 = sand.u32 1, %s740_s15  }
 0x1ac   : > { %p1029_p4 = scmp.ne.s32.totalorder %s1023_s8, 0  ;;  %s401_s9 = scalar_lea.sflag [#allocation4], %s400_s13 }
 0x1ae   : > { %p557_p6 = pnand %p561_p12, %p1029_p4 }
 0x1b0   : > { %735 = dma.done.wait (!%p557_p6), %s401_s9, 128  }
 0x1b1   : > { %737 = vsyncadd (!%p557_p6), %s401_s9, 4294967168  ;;  %s21_s22 = sadd.s32 1, %s768_s22   ;;  %s1030_s23 = sld [smem:[#allocation8_spill]] }
 0x1b2   : > { %p18_p3 = scmp.ge.s32.totalorder %s21_s22, 6   ;;  %s1031_s15 = smov %s744_s16 }
 0x1b3   : > { %s1032_s16 = smov %s748_s17  ;;  %s1033_s17 = smov %s879_s10 }
 0x1b4   : > { %s1034_s18 = smov %s760_s20  ;;  %s1035_s19 = smov %s764_s21 }
 0x1b5   : > { %s1036_s20 = smov %s1039_s25  ;;  %20 = sbr.rel (!%p18_p3) target bundleno = 9 (0x9), region = 95 }
 0x1b7   : > { %s1037_s21 = smov %s1030_s23 }
 0x1bc   :  { %416 = vsyncpa [#allocation3], 1 }
 0x1bd   :  { %418 = vsyncpa [#allocation3 + $0x1], 1 }
 0x1be   :  { %419 = vsyncpa [#allocation4], 1 }
 0x1bf   :  { %421 = vsyncpa [#allocation4 + $0x1], 1 }

</bundles_post_ra>
